<compile_context>
chip_gen: v7x
topology: tpu7x:2x2x1
jax: 0.10.0
libtpu: 0.0.40
codegen_flags: <defaults>
</compile_context>

<pallas_src>
import math

import jax
import jax.numpy as jnp
from jax.experimental import pallas as pl
from jax.experimental.pallas import tpu as pltpu

LANE = 128            # hidden dim padded to 128 lanes (once, at prepare time)
DEFAULT_TILE_B = 512  # rows per grid step (mem-bound sweet spot per measured roofline)


def _round_up(x, m):
    return (x + m - 1) // m * m


def _cdiv(a, b):
    return (a + b - 1) // b


# ----------------------------------------------------------------------------
# Kernel: fused 4-layer MLP (3x ReLU, final layer linear -> logits)
# ----------------------------------------------------------------------------
def actor_mlp_kernel(x_ref,
                     w1_ref, b1_ref,
                     w2_ref, b2_ref,
                     w3_ref, b3_ref,
                     w4_ref, b4_ref,
                     out_ref):
    # x and weights arrive as bf16 (MXU operands); accumulate, bias-add and ReLU in f32.
    h = jnp.dot(x_ref[...], w1_ref[...],
                preferred_element_type=jnp.float32) + b1_ref[...]
    h = jnp.maximum(h, 0.0)

    h = jnp.dot(h.astype(jnp.bfloat16), w2_ref[...],
                preferred_element_type=jnp.float32) + b2_ref[...]
    h = jnp.maximum(h, 0.0)

    h = jnp.dot(h.astype(jnp.bfloat16), w3_ref[...],
                preferred_element_type=jnp.float32) + b3_ref[...]
    h = jnp.maximum(h, 0.0)

    logits = jnp.dot(h.astype(jnp.bfloat16), w4_ref[...],
                     preferred_element_type=jnp.float32) + b4_ref[...]
    out_ref[...] = logits.astype(out_ref.dtype)


# ----------------------------------------------------------------------------
# Wrapper: batch-tiled pallas_call with resident weights; no feature-dim padding of x/out
# ----------------------------------------------------------------------------
def actor_forward(x, prepared, n_actions, tile_b=DEFAULT_TILE_B):
    """Run the fused Actor MLP.

    x:        (B, obs_shape + n_agents) float32 or bfloat16 (logical, un-padded)
    prepared: dict from prepare_actor_params() — bf16 weights (hidden dim padded to 128),
              f32 biases.
    Returns:  (B, n_actions) float32 logits.
    """
    B, d_in = x.shape
    hp = prepared["w2"].shape[0]                      # padded hidden dim
    assert prepared["w1"].shape == (d_in, hp)
    assert prepared["w4"].shape == (hp, n_actions)

    # Stream x as bf16 (half the input HBM bytes). Ideally this cast is fused into the
    # producer of x; here it's a single cheap elementwise pass.
    x_bf = x if x.dtype == jnp.bfloat16 else x.astype(jnp.bfloat16)

    params = (prepared["w1"], prepared["b1"],
              prepared["w2"], prepared["b2"],
              prepared["w3"], prepared["b3"],
              prepared["w4"], prepared["b4"])

    flops = 2 * B * (d_in * hp + 2 * hp * hp + hp * n_actions)
    bytes_accessed = (int(x_bf.size) * x_bf.dtype.itemsize
                      + B * n_actions * 4
                      + sum(int(p.size) * p.dtype.itemsize for p in params))
    cost = pl.CostEstimate(flops=flops, transcendentals=0,
                           bytes_accessed=bytes_accessed)

    out_shape = jax.ShapeDtypeStruct((B, n_actions), jnp.float32)

    # --- batch tile selection -------------------------------------------------
    tb = min(tile_b, _round_up(B, 8))
    if B > 16:
        # Ensure >= 2 batch blocks so the "parallel" axis can shard across v7x TCs.
        tb = min(tb, _round_up(_cdiv(B, 2), 8))
    tb = max(tb, 8)
    n_blocks = _cdiv(B, tb)                           # ragged last block is fine

    if n_blocks == 1:
        # Small-batch fast path: whole problem in VMEM, no grid / pipeline machinery.
        return pl.pallas_call(
            actor_mlp_kernel,
            out_shape=out_shape,
            cost_estimate=cost,
        )(x_bf, *params)

    def resident(shape):
        # Same block index every grid step -> DMA'd once, stays VMEM-resident.
        return pl.BlockSpec(shape, lambda i: (0, 0))

    return pl.pallas_call(
        actor_mlp_kernel,
        out_shape=out_shape,
        grid=(n_blocks,),
        in_specs=[
            pl.BlockSpec((tb, d_in), lambda i: (i, 0)),   # x: streamed bf16 batch tiles
            resident((d_in, hp)), resident((1, hp)),      # fc1
            resident((hp, hp)), resident((1, hp)),        # fc2
            resident((hp, hp)), resident((1, hp)),        # fc3
            resident((hp, n_actions)), resident((1, n_actions)),  # fc_out (un-padded N)
        ],
        out_specs=pl.BlockSpec((tb, n_actions), lambda i: (i, 0)),
        compiler_params=pltpu.CompilerParams(
            dimension_semantics=("parallel",),            # batch tiles independent
        ),
        cost_estimate=cost,
    )(x_bf, *params)


# ----------------------------------------------------------------------------
# Parameter init (matches PyTorch xavier_uniform_ semantics) + one-time prep
# ----------------------------------------------------------------------------
def xavier_uniform(key, fan_in, fan_out, gain=1.0):
    # PyTorch xavier_uniform_: U(-a, a), a = gain * sqrt(6 / (fan_in + fan_out))
    a = gain * math.sqrt(6.0 / (fan_in + fan_out))
    return jax.random.uniform(key, (fan_in, fan_out), jnp.float32, -a, a)


def init_actor_params(key, obs_shape, n_agents, hidden_dim, n_actions):
    input_dim = obs_shape + n_agents
    k1, k2, k3, k4 = jax.random.split(key, 4)
    return {
        "w1": xavier_uniform(k1, input_dim, hidden_dim),
        "b1": jnp.zeros((1, hidden_dim), jnp.float32),
        "w2": xavier_uniform(k2, hidden_dim, hidden_dim),
        "b2": jnp.zeros((1, hidden_dim), jnp.float32),
        "w3": xavier_uniform(k3, hidden_dim, hidden_dim),
        "b3": jnp.zeros((1, hidden_dim), jnp.float32),
        "w4": xavier_uniform(k4, hidden_dim, n_actions, gain=0.1),
        "b4": jnp.zeros((1, n_actions), jnp.float32),
    }


def prepare_actor_params(params):
    """One-time prep: cast weights to bf16; zero-pad ONLY the hidden dim to 128 lanes.

    Input dim (x's feature dim) and n_actions stay un-padded so streamed tensors carry no
    padding bytes; zero-padded hidden columns produce ReLU(0)=0 and contribute nothing.
    """
    def pad_to(a, rows, cols, dtype):
        return (jnp.zeros((rows, cols), dtype)
                .at[:a.shape[0], :a.shape[1]].set(a.astype(dtype)))

    d_in, h = params["w1"].shape
    _, a = params["w4"].shape
    hp = _round_up(h, LANE)
    return {
        "w1": pad_to(params["w1"], d_in, hp, jnp.bfloat16),
        "b1": pad_to(params["b1"], 1, hp, jnp.float32),
        "w2": pad_to(params["w2"], hp, hp, jnp.bfloat16),
        "b2": pad_to(params["b2"], 1, hp, jnp.float32),
        "w3": pad_to(params["w3"], hp, hp, jnp.bfloat16),
        "b3": pad_to(params["b3"], 1, hp, jnp.float32),
        "w4": pad_to(params["w4"], hp, a, jnp.bfloat16),
        "b4": pad_to(params["b4"], 1, a, jnp.float32),
    }


# ----------------------------------------------------------------------------
# Reference (plain JAX, same bf16-operand / f32-accumulate recipe) for sanity check
# ----------------------------------------------------------------------------
def actor_forward_ref(x, p):
    def mm(a, w):
        return jnp.dot(a.astype(jnp.bfloat16), w.astype(jnp.bfloat16),
                       preferred_element_type=jnp.float32)
    h = jnp.maximum(mm(x, p["w1"]) + p["b1"], 0.0)
    h = jnp.maximum(mm(h, p["w2"]) + p["b2"], 0.0)
    h = jnp.maximum(mm(h, p["w3"]) + p["b3"], 0.0)
    return mm(h, p["w4"]) + p["b4"]


if __name__ == "__main__":
    # Shapes consistent with the module's forward:
    #   args.obs_shape=28, args.n_agents=4 -> input_dim=32
    #   args.hidden_dim=32, args.n_actions=8
    obs_shape, n_agents, hidden_dim, n_actions = 28, 4, 32, 8

    key = jax.random.PRNGKey(0)
    k_params, k_x1, k_x2 = jax.random.split(key, 3)

    params = init_actor_params(k_params, obs_shape, n_agents, hidden_dim, n_actions)
    prepared = prepare_actor_params(params)

    # 1) Small-batch fast path (single block, no grid).
    x_small = jax.random.normal(k_x1, (8, obs_shape + n_agents), jnp.float32)
    out_small = jax.block_until_ready(actor_forward(x_small, prepared, n_actions))
    ref_small = actor_forward_ref(x_small, params)
    assert out_small.shape == (8, n_actions)
    assert jnp.allclose(out_small, ref_small, atol=2e-3, rtol=2e-3), "fast-path mismatch"

    # 2) Grid path: >=2 batch blocks + ragged last block (exercises megacore split on v7x).
    x_big = jax.random.normal(k_x2, (40, obs_shape + n_agents), jnp.float32)
    out_big = jax.block_until_ready(actor_forward(x_big, prepared, n_actions))
    ref_big = actor_forward_ref(x_big, params)
    assert out_big.shape == (40, n_actions)
    assert jnp.allclose(out_big, ref_big, atol=2e-3, rtol=2e-3), "grid-path mismatch"

    print("KERNEL_OK")
</pallas_src>

<mosaic_0001>
module attributes {stable_mosaic.version = 11 : i64} {
  func.func @actor_mlp_kernel(%arg0: memref<8x32xbf16, #tpu.memory_space<vmem>>, %arg1: memref<32x128xbf16, #tpu.memory_space<vmem>>, %arg2: memref<1x128xf32, #tpu.memory_space<vmem>>, %arg3: memref<128x128xbf16, #tpu.memory_space<vmem>>, %arg4: memref<1x128xf32, #tpu.memory_space<vmem>>, %arg5: memref<128x128xbf16, #tpu.memory_space<vmem>>, %arg6: memref<1x128xf32, #tpu.memory_space<vmem>>, %arg7: memref<128x8xbf16, #tpu.memory_space<vmem>>, %arg8: memref<1x8xf32, #tpu.memory_space<vmem>>, %arg9: memref<8x8xf32, #tpu.memory_space<vmem>>) attributes {dimension_semantics = [], scalar_prefetch = 0 : i64, scratch_operands = 0 : i64, tpu.core_type = #tpu.core_type<tc>} {
    %c0 = arith.constant 0 : index
    %c0_0 = arith.constant 0 : index
    %0 = vector.load %arg0[%c0, %c0_0] : memref<8x32xbf16, #tpu.memory_space<vmem>>, vector<8x32xbf16>
    %c0_1 = arith.constant 0 : index
    %c0_2 = arith.constant 0 : index
    %1 = vector.load %arg1[%c0_1, %c0_2] : memref<32x128xbf16, #tpu.memory_space<vmem>>, vector<32x128xbf16>
    %cst = arith.constant dense<0.000000e+00> : vector<8x128xf32>
    %2 = tpu.matmul %0, %1, %cst {dimension_numbers = #tpu.dot_dimension_numbers<[1], [0], [0], [1], [0, 0, 1, 1], [], []>} : vector<8x32xbf16>, vector<32x128xbf16>, vector<8x128xf32> -> vector<8x128xf32>
    %c0_3 = arith.constant 0 : index
    %c0_4 = arith.constant 0 : index
    %3 = vector.load %arg2[%c0_3, %c0_4] : memref<1x128xf32, #tpu.memory_space<vmem>>, vector<1x128xf32>
    %4 = vector.broadcast %3 : vector<1x128xf32> to vector<8x128xf32>
    %5 = arith.addf %2, %4 : vector<8x128xf32>
    %cst_5 = arith.constant 0.000000e+00 : f32
    %6 = vector.broadcast %cst_5 : f32 to vector<8x128xf32>
    %7 = arith.maximumf %5, %6 : vector<8x128xf32>
    %8 = arith.truncf %7 : vector<8x128xf32> to vector<8x128xbf16>
    %c0_6 = arith.constant 0 : index
    %c0_7 = arith.constant 0 : index
    %9 = vector.load %arg3[%c0_6, %c0_7] : memref<128x128xbf16, #tpu.memory_space<vmem>>, vector<128x128xbf16>
    %cst_8 = arith.constant dense<0.000000e+00> : vector<8x128xf32>
    %10 = tpu.matmul %8, %9, %cst_8 {dimension_numbers = #tpu.dot_dimension_numbers<[1], [0], [0], [1], [0, 0, 1, 1], [], []>} : vector<8x128xbf16>, vector<128x128xbf16>, vector<8x128xf32> -> vector<8x128xf32>
    %c0_9 = arith.constant 0 : index
    %c0_10 = arith.constant 0 : index
    %11 = vector.load %arg4[%c0_9, %c0_10] : memref<1x128xf32, #tpu.memory_space<vmem>>, vector<1x128xf32>
    %12 = vector.broadcast %11 : vector<1x128xf32> to vector<8x128xf32>
    %13 = arith.addf %10, %12 : vector<8x128xf32>
    %cst_11 = arith.constant 0.000000e+00 : f32
    %14 = vector.broadcast %cst_11 : f32 to vector<8x128xf32>
    %15 = arith.maximumf %13, %14 : vector<8x128xf32>
    %16 = arith.truncf %15 : vector<8x128xf32> to vector<8x128xbf16>
    %c0_12 = arith.constant 0 : index
    %c0_13 = arith.constant 0 : index
    %17 = vector.load %arg5[%c0_12, %c0_13] : memref<128x128xbf16, #tpu.memory_space<vmem>>, vector<128x128xbf16>
    %cst_14 = arith.constant dense<0.000000e+00> : vector<8x128xf32>
    %18 = tpu.matmul %16, %17, %cst_14 {dimension_numbers = #tpu.dot_dimension_numbers<[1], [0], [0], [1], [0, 0, 1, 1], [], []>} : vector<8x128xbf16>, vector<128x128xbf16>, vector<8x128xf32> -> vector<8x128xf32>
    %c0_15 = arith.constant 0 : index
    %c0_16 = arith.constant 0 : index
    %19 = vector.load %arg6[%c0_15, %c0_16] : memref<1x128xf32, #tpu.memory_space<vmem>>, vector<1x128xf32>
    %20 = vector.broadcast %19 : vector<1x128xf32> to vector<8x128xf32>
    %21 = arith.addf %18, %20 : vector<8x128xf32>
    %cst_17 = arith.constant 0.000000e+00 : f32
    %22 = vector.broadcast %cst_17 : f32 to vector<8x128xf32>
    %23 = arith.maximumf %21, %22 : vector<8x128xf32>
    %24 = arith.truncf %23 : vector<8x128xf32> to vector<8x128xbf16>
    %c0_18 = arith.constant 0 : index
    %c0_19 = arith.constant 0 : index
    %25 = vector.load %arg7[%c0_18, %c0_19] : memref<128x8xbf16, #tpu.memory_space<vmem>>, vector<128x8xbf16>
    %cst_20 = arith.constant dense<0.000000e+00> : vector<8x8xf32>
    %26 = tpu.matmul %24, %25, %cst_20 {dimension_numbers = #tpu.dot_dimension_numbers<[1], [0], [0], [1], [0, 0, 1, 1], [], []>} : vector<8x128xbf16>, vector<128x8xbf16>, vector<8x8xf32> -> vector<8x8xf32>
    %c0_21 = arith.constant 0 : index
    %c0_22 = arith.constant 0 : index
    %27 = vector.load %arg8[%c0_21, %c0_22] : memref<1x8xf32, #tpu.memory_space<vmem>>, vector<1x8xf32>
    %28 = vector.broadcast %27 : vector<1x8xf32> to vector<8x8xf32>
    %29 = arith.addf %26, %28 : vector<8x8xf32>
    %c0_23 = arith.constant 0 : index
    %c0_24 = arith.constant 0 : index
    %30 = vector.load %arg9[%c0_23, %c0_24] : memref<8x8xf32, #tpu.memory_space<vmem>>, vector<8x8xf32>
    tpu.vector_store %arg9[%c0_23, %c0_24], %29 {strides = array<i32>} : memref<8x8xf32, #tpu.memory_space<vmem>>, vector<8x8xf32>,
    return
  }
}

</mosaic_0001>

<bundles_post_ra>
// kernel: tpu_custom_call.1
= control target key start
LH: loop header
LB: loop body
LE: loop exit
PB: predicated region body
PF: predicated region fallthrough
CT: control target
= control target key end

     0   :  { %14 = vsyncpa [#allocation3], 0  ;;  %s911_s0 = inlined_call_operand.vmem [shape: bf16[8,32], index: 0, kind: input, shape index: {}]   ;;  %s912_s1 = inlined_call_operand.hbm [shape: bf16[32,128], index: 1, kind: input, shape index: {}]   ;;  %s913_s2 = inlined_call_operand.vmem [shape: f32[1,128], index: 2, kind: input, shape index: {}]   ;;  %s914_s3 = inlined_call_operand.vmem [shape: bf16[128,128], index: 3, kind: input, shape index: {}]   ;;  %s915_s4 = inlined_call_operand.vmem [shape: f32[1,128], index: 4, kind: input, shape index: {}]   ;;  %s916_s5 = inlined_call_operand.hbm [shape: bf16[128,128], index: 5, kind: input, shape index: {}]   ;;  %s917_s6 = inlined_call_operand.vmem [shape: f32[1,128], index: 6, kind: input, shape index: {}]   ;;  %s918_s7 = inlined_call_operand.vmem [shape: bf16[128,8], index: 7, kind: input, shape index: {}]   ;;  %s919_s8 = inlined_call_operand.vmem [shape: f32[1,8], index: 8, kind: input, shape index: {}]   ;;  %s920_s9 = inlined_call_operand.hbm [shape: f32[8,8], index: 9, kind: output, shape index: {}]  }
   0x1   :  { %15 = vsyncpa [#allocation6], 0 }
   0x2   :  { %16 = vsyncpa [#allocation4], 0  ;;  %s721_s30 = smov [#allocation2]   ;;  %s649_s13 = scalar_lea.hbm %s912_s1, 256 }
   0x3   :  { %s24_s10 = sshll.u32 %s721_s30, 4  ;;  %p650_p0 = scmp.ne.s32.totalorder %s912_s1, %s649_s13  ;;  %s25_s10 = int_to_ptr.vmem [resolvable:$true] %s24_s10 }
   0x4   :  { %p653_p1 = scmp.lt.u32.totalorder %s649_s13, %s912_s1 }
   0x6   :  { %p655_p2 = pnand %p653_p1, %p650_p0 }
   0x8   :  { %658 = shalt.err (!%p655_p2)
}
   0x9   :  { %s659_s18 = scalar_lea.vmem %s25_s10, 256  ;;  %p664_p4 = scmp.lt.s32.totalorder %s25_s10, %s25_s10 }
   0xa   :  { %p660_p3 = scmp.ne.s32.totalorder %s25_s10, %s659_s18  ;;  %p665_p5 = scmp.lt.s32.totalorder %s659_s18, %s659_s18 }
   0xc   :  { %p666_p6 = por %p665_p5, %p664_p4 }
   0xe   :  { %p667_p7 = pnand %p666_p6, %p660_p3 }
  0x10   :  { %670 = shalt.err (!%p667_p7)
}
  0x11   :  { %s722_s19 = smov 64   ;;  %s723_s20 = smov 4  }
  0x12   :  { %30 = dma.hbm_to_vmem [thread:$0]  %s912_s1, 256, %s25_s10, [#allocation3], %s722_s19, %s722_s19, %s723_s20  }
  0x13   :  { %s724_s23 = smov [#allocation5]   ;;  %s671_s27 = scalar_lea.hbm %s916_s5, 1024 }
  0x14   :  { %s42_s24 = sshll.u32 %s724_s23, 4  ;;  %p672_p8 = scmp.ne.s32.totalorder %s916_s5, %s671_s27  ;;  %s43_s24 = int_to_ptr.vmem [resolvable:$true] %s42_s24 }
  0x15   :  { %p675_p9 = scmp.lt.u32.totalorder %s671_s27, %s916_s5 }
  0x17   :  { %p677_p10 = pnand %p675_p9, %p672_p8 }
  0x19   :  { %680 = shalt.err (!%p677_p10)
}
  0x1a   :  { %s681_s12 = scalar_lea.vmem %s43_s24, 1024  ;;  %p686_p12 = scmp.lt.s32.totalorder %s43_s24, %s43_s24 }
  0x1b   :  { %p682_p11 = scmp.ne.s32.totalorder %s43_s24, %s681_s12  ;;  %p687_p13 = scmp.lt.s32.totalorder %s681_s12, %s681_s12 }
  0x1d   :  { %p688_p0 = por %p687_p13, %p686_p12 }
  0x1f   :  { %p689_p1 = pnand %p688_p0, %p682_p11 }
  0x21   :  { %692 = shalt.err (!%p689_p1)
}
  0x22   :  { %48 = dma.hbm_to_vmem [thread:$0]  %s916_s5, 1024, %s43_s24, [#allocation6], %s722_s19, %s722_s19, %s723_s20  }
  0x23   :  { %715 = dma.done.wait [#allocation3], 256  }
  0x24   :  { %716 = vsyncadd [#allocation3], 4294967040 }
  0x25   :  { %717 = dma.done.wait [#allocation6], 1024  }
  0x26   :  { %718 = vsyncadd [#allocation6], 4294966272  ;;  %v725_v0 = vmov 0.0   ;;  %vm726_vm0 = vmmov 0   ;;  %v623_v1 = vld [vmem:[#allocation2] sm:$0xff]   ;;  %v624_v2 = vld [vmem:[#allocation2 + $0x8] sm:$0xff]  }
  0x27   :  { %548 = vmatprep.subr.bf16.mxu0 %v725_v0  ;;  %552 = vmatprep.mubr.msk.bf16.mxu0 %vm726_vm0, %v725_v0  ;;  %v625_v3 = vld [vmem:[%s914_s3] sm:$0xff]   ;;  %vm86_vm1 = vcmask 261120   ;;  %v626_v4 = vld [vmem:[%s914_s3 + $0x8] sm:$0xff]   ;;  %v627_v6 = vld [vmem:[%s914_s3 + $0x10] sm:$0xff]   ;;  %s727_s26 = smov [#allocation7]   ;;  %vm469_vm2 = vcmask 64512  }
  0x28   :  { %556 = vmatprep.subr.bf16.mxu1 %v725_v0  ;;  %572 = vmatprep.mubr.msk.bf16.mxu1 %vm726_vm0, %v725_v0  ;;  %v62_v5 = vld [vmem:[%s911_s0] sm:$0xf]  ;;  %v628_v7 = vld [vmem:[%s914_s3 + $0x18] sm:$0xff]   ;;  %v630_v9 = vld [vmem:[%s914_s3 + $0x28] sm:$0xff]   ;;  %s477_s27 = sshll.u32 %s727_s26, 4  ;;  %s478_s27 = int_to_ptr.vmem [resolvable:$true] %s477_s27 }
  0x29   :  { %549 = vmatpush3.bf16.msra.mxu0 %v623_v1  ;;  %557 = vmatpush3.bf16.msra.mxu1 %v625_v3  ;;  %v629_v8 = vld [vmem:[%s914_s3 + $0x20] sm:$0xff]   ;;  %v631_v10 = vld [vmem:[%s914_s3 + $0x30] sm:$0xff]   ;;  %v632_v11 = vld [vmem:[%s914_s3 + $0x38] sm:$0xff]   ;;  %p698_p3 = scmp.lt.s32.totalorder %s478_s27, %s478_s27 }
  0x2a   :  { %550 = vmatprep.subr.bf16.mxu0 %v725_v0  ;;  %558 = vmatprep.subr.bf16.mxu1 %v725_v0  ;;  %v633_v12 = vld [vmem:[#allocation5] sm:$0xff]   ;;  %v634_v13 = vld [vmem:[#allocation5 + $0x8] sm:$0xff]   ;;  %v635_v14 = vld [vmem:[#allocation5 + $0x10] sm:$0xff]  }
  0x2b   :  { %v636_v15 = vld [vmem:[#allocation5 + $0x18] sm:$0xff]   ;;  %v637_v16 = vld [vmem:[#allocation5 + $0x20] sm:$0xff]   ;;  %v638_v17 = vld [vmem:[#allocation5 + $0x28] sm:$0xff]  }
  0x2c   :  { %v487_v18 = vld [vmem:[%s913_s2] ss:$0 sm:$0xff]  ;;  %v640_v27 = vld [vmem:[#allocation5 + $0x38] sm:$0xff]   ;;  %v643_v30 = vld [vmem:[%s918_s7 + $0x10] sm:$0xff]  }
  0x2d   :  { %551 = vmatpush3.bf16.msra.mxu0 %v624_v2  ;;  %559 = vmatpush3.bf16.msra.mxu1 %v626_v4  ;;  %v639_v26 = vld [vmem:[#allocation5 + $0x30] sm:$0xff]   ;;  %v642_v29 = vld [vmem:[%s918_s7 + $0x8] sm:$0xff]   ;;  %v644_v31 = vld [vmem:[%s918_s7 + $0x18] sm:$0xff]  }
  0x2e   :  { %576 = vmatprep.subr.bf16.mxu0 %v725_v0  ;;  %560 = vmatprep.subr.bf16.mxu1 %v725_v0  ;;  %v641_v28 = vld [vmem:[%s918_s7] sm:$0xff]   ;;  %v646_v33 = vld [vmem:[%s918_s7 + $0x28] sm:$0xff]   ;;  %v647_v42 = vld [vmem:[%s918_s7 + $0x30] sm:$0xff]  }
  0x2f   :  { %v645_v32 = vld [vmem:[%s918_s7 + $0x20] sm:$0xff]   ;;  %v648_v43 = vld [vmem:[%s918_s7 + $0x38] sm:$0xff]  }
  0x30   :  { %553 = vmatmul.mubr.msk.bf16.vlgmr.msra.gmra.mrb[0].mxu0 %vm86_vm1, %v62_v5  ;;  %v491_v34 = vld [vmem:[%s915_s4] ss:$0 sm:$0xff] }
  0x31   :  { %592 = vmatprep.mubr.msk.bf16.mxu0 %vm726_vm0, %v725_v0  ;;  %561 = vmatpush3.bf16.msra.mxu1 %v627_v6  ;;  %v500_v44 = vld [vmem:[%s917_s6] ss:$0 sm:$0xff]  ;;  %s693_s6 = scalar_lea.vmem %s478_s27, 128 }
  0x32   :  { %562 = vmatprep.subr.bf16.mxu1 %v725_v0  ;;  %577 = vmatpush3.bf16.msra.mxu0 %v633_v12  ;;  %v509_v52 = vld [vmem:[%s919_s8] ss:$0 sm:$0xff]  ;;  %p694_p2 = scmp.ne.s32.totalorder %s478_s27, %s693_s6  ;;  %p699_p4 = scmp.lt.s32.totalorder %s693_s6, %s693_s6 }
  0x33   :  { %578 = vmatprep.subr.bf16.mxu0 %v725_v0 }
  0x34   :  { %p700_p5 = por %p699_p4, %p698_p3 }
  0x35   :  { %563 = vmatpush3.bf16.msra.mxu1 %v628_v7 }
  0x36   :  { %564 = vmatprep.subr.bf16.mxu1 %v725_v0  ;;  %579 = vmatpush3.bf16.msra.mxu0 %v634_v13  ;;  %p701_p6 = pnand %p700_p5, %p694_p2 }
  0x37   :  { %580 = vmatprep.subr.bf16.mxu0 %v725_v0 }
  0x39   :  { %565 = vmatpush3.bf16.msra.mxu1 %v629_v8 }
  0x3a   :  { %566 = vmatprep.subr.bf16.mxu1 %v725_v0  ;;  %581 = vmatpush3.bf16.msra.mxu0 %v635_v14 }
  0x3b   :  { %582 = vmatprep.subr.bf16.mxu0 %v725_v0 }
  0x3d   :  { %567 = vmatpush3.bf16.msra.mxu1 %v630_v9 }
  0x3e   :  { %568 = vmatprep.subr.bf16.mxu1 %v725_v0  ;;  %583 = vmatpush3.bf16.msra.mxu0 %v636_v15 }
  0x3f   :  { %584 = vmatprep.subr.bf16.mxu0 %v725_v0 }
  0x41   :  { %569 = vmatpush3.bf16.msra.mxu1 %v631_v10 }
  0x42   :  { %570 = vmatprep.subr.bf16.mxu1 %v725_v0  ;;  %585 = vmatpush3.bf16.msra.mxu0 %v637_v16 }
  0x43   :  { %586 = vmatprep.subr.bf16.mxu0 %v725_v0 }
  0x45   :  { %571 = vmatpush3.bf16.msra.mxu1 %v632_v11 }
  0x46   :  { %596 = vmatprep.subr.bf16.mxu1 %v725_v0  ;;  %587 = vmatpush3.bf16.msra.mxu0 %v638_v17 }
  0x47   :  { %588 = vmatprep.subr.bf16.mxu0 %v725_v0 }
  0x4a   :  { %589 = vmatpush3.bf16.msra.mxu0 %v639_v26 }
  0x4b   :  { %590 = vmatprep.subr.bf16.mxu0 %v725_v0 }
  0x4e   :  { %591 = vmatpush3.bf16.msra.mxu0 %v640_v27 }
 0x103   :  { %v124_v19 = vpop.f32.mrb[0].mxu0 }
 0x104   :  { %v125_v20 = vadd.f32 %v487_v18, %v124_v19  ;;  %v554_v21 = vpop.f32.mrb[1].mxu0 }
 0x105   :  { %v127_v22 = vpop.f32.mrb[2].mxu0 }
 0x106   :  { %v130_v23 = vmax.f32 %v125_v20, 0.0  ;;  %v555_v24 = vpop.f32.mrb[3].mxu0 }
 0x108   :  { %v131_v25 = vpack.c.bf16 %v130_v23, %v130_v23 }
 0x10a   :  { %573 = vmatmul.mubr.bf16.vlgmr.msra.gmra.mrb[0].mxu1 %v131_v25 }
 0x10b   :  { %612 = vmatprep.mubr.msk.bf16.mxu1 %vm726_vm0, %v725_v0  ;;  %597 = vmatpush3.bf16.msra.mxu1 %v641_v28 }
 0x10c   :  { %598 = vmatprep.subr.bf16.mxu1 %v725_v0 }
 0x10f   :  { %599 = vmatpush3.bf16.msra.mxu1 %v642_v29 }
 0x110   :  { %600 = vmatprep.subr.bf16.mxu1 %v725_v0 }
 0x113   :  { %601 = vmatpush3.bf16.msra.mxu1 %v643_v30 }
 0x114   :  { %602 = vmatprep.subr.bf16.mxu1 %v725_v0 }
 0x117   :  { %603 = vmatpush3.bf16.msra.mxu1 %v644_v31 }
 0x118   :  { %604 = vmatprep.subr.bf16.mxu1 %v725_v0 }
 0x11b   :  { %605 = vmatpush3.bf16.msra.mxu1 %v645_v32 }
 0x11c   :  { %606 = vmatprep.subr.bf16.mxu1 %v725_v0 }
 0x11f   :  { %607 = vmatpush3.bf16.msra.mxu1 %v646_v33 }
 0x120   :  { %608 = vmatprep.subr.bf16.mxu1 %v725_v0 }
 0x123   :  { %609 = vmatpush3.bf16.msra.mxu1 %v647_v42 }
 0x124   :  { %610 = vmatprep.subr.bf16.mxu1 %v725_v0 }
 0x127   :  { %611 = vmatpush3.bf16.msra.mxu1 %v648_v43 }
 0x1dd   :  { %v237_v35 = vpop.f32.mrb[0].mxu1 }
 0x1de   :  { %v238_v36 = vadd.f32 %v491_v34, %v237_v35  ;;  %v574_v37 = vpop.f32.mrb[1].mxu1 }
 0x1df   :  { %v240_v38 = vpop.f32.mrb[2].mxu1 }
 0x1e0   :  { %v243_v39 = vmax.f32 %v238_v36, 0.0  ;;  %v575_v40 = vpop.f32.mrb[3].mxu1 }
 0x1e2   :  { %v244_v41 = vpack.c.bf16 %v243_v39, %v243_v39 }
 0x1e4   :  { %593 = vmatmul.mubr.bf16.vlgmr.msra.gmra.mrb[4].mxu0 %v244_v41 }
 0x2b7   :  { %v350_v45 = vpop.f32.mrb[4].mxu0 }
 0x2b8   :  { %v351_v46 = vadd.f32 %v500_v44, %v350_v45  ;;  %v594_v47 = vpop.f32.mrb[5].mxu0 }
 0x2b9   :  { %v353_v48 = vpop.f32.mrb[6].mxu0 }
 0x2ba   :  { %v356_v49 = vmax.f32 %v351_v46, 0.0  ;;  %v595_v50 = vpop.f32.mrb[7].mxu0 }
 0x2bc   :  { %v357_v51 = vpack.c.bf16 %v356_v49, %v356_v49 }
 0x2be   :  { %613 = vmatmul.mubr.bf16.vlgmr.msra.gmra.mrb[4].mxu1 %v357_v51 }
 0x391   :  { %v463_v53 = vpop.f32.mrb[4].mxu1 }
 0x392   :  { %v464_v54 = vadd.f32 %v509_v52, %v463_v53  ;;  %v614_v55 = vpop.f32.mrb[5].mxu1 }
 0x393   :  { %v466_v56 = vpop.f32.mrb[6].mxu1 }
 0x394   :  { %v615_v57 = vpop.f32.mrb[7].mxu1  ;;  %470 = vst.msk [vmem:[#allocation7] sm:$0xff] %vm469_vm2, %v464_v54 }
 0x395   :  { %704 = shalt.err (!%p701_p6)
}
 0x396   :  { %s705_s8 = scalar_lea.hbm %s920_s9, 128 }
 0x397   :  { %p706_p7 = scmp.ne.s32.totalorder %s920_s9, %s705_s8  ;;  %p709_p8 = scmp.lt.u32.totalorder %s705_s8, %s920_s9 }
 0x399   :  { %p711_p9 = pnand %p709_p8, %p706_p7 }
 0x39b   :  { %714 = shalt.err (!%p711_p9)
}
 0x39c   :  { %480 = dma.vmem_to_hbm [thread:$0]  %s478_s27, 128, %s920_s9, [#allocation4]  }
 0x39d   :  { %719 = dma.done.wait [#allocation4], 128  }
 0x39e   :  { %720 = vsyncadd [#allocation4], 4294967168 }
 0x39f   :  { %484 = vsyncpa [#allocation3], 1 }
 0x3a0   :  { %485 = vsyncpa [#allocation6], 1 }
 0x3a1   :  { %486 = vsyncpa [#allocation4], 1 }

</bundles_post_ra>
